<compile_context>
chip_gen: v5e
topology: v5e:2x2
jax: 0.10.0
libtpu: 0.0.40
codegen_flags: <defaults>
</compile_context>

<pallas_src>
import jax
import jax.numpy as jnp
from jax.experimental import pallas as pl
from jax.experimental.pallas import tpu as pltpu

VARIANCE_EPSILON = 1e-12


def _layernorm_kernel(x_ref, w_ref, b_ref, o_ref):
    # x_ref: (TILE_ROWS, H) tile; w_ref / b_ref: (1, H) f32 (pre-cast in the wrapper);
    # o_ref: (TILE_ROWS, H) in the input dtype.
    xf = x_ref[...].astype(jnp.float32)

    # Single-pass stats in f32: one sweep over xf feeds both reductions,
    # var = E[x^2] - E[x]^2 (clamped), instead of re-materializing (x - u) twice.
    m = jnp.mean(xf, axis=-1, keepdims=True)            # E[x]   (XLU reduce)
    m2 = jnp.mean(xf * xf, axis=-1, keepdims=True)      # E[x^2] (XLU reduce)
    var = jnp.maximum(m2 - m * m, 0.0)
    inv = jax.lax.rsqrt(var + VARIANCE_EPSILON)          # EUP slot, effectively free

    y = (xf - m) * inv
    # Whole affine in f32 (reference semantics); cast only at the store.
    o_ref[...] = (w_ref[...] * y + b_ref[...]).astype(o_ref.dtype)


def _vmem_plan():
    """(tile_budget_bytes, vmem_limit_bytes_or_None) gated on the TPU generation."""
    try:
        kind = jax.devices()[0].device_kind.lower()
    except Exception:  # pragma: no cover - defensive
        kind = ""
    if "v7" in kind or "tpu7" in kind:
        # v7x: 64 MiB physical VMEM per TensorCore -> stay well under it.
        return 36 * 1024 * 1024, 48 * 1024 * 1024
    if "v6" in kind or "v5" in kind:
        # v5e/v5p/v6e: 128 MiB physical; only the 16/32 MiB scoped default is in
        # the way, so raise it and grow the tiles.
        return 48 * 1024 * 1024, 96 * 1024 * 1024
    # Unknown / older chips: conservative, known-good defaults.
    return 12 * 1024 * 1024, None


def _pick_tile_rows(rows, hidden, in_itemsize, vmem_budget_bytes):
    """Largest multiple-of-8 row tile whose VMEM footprint fits the budget."""
    # Per-row footprint:
    #   input tile,  double-buffered: 2 * H * itemsize
    #   output tile, double-buffered: 2 * H * itemsize
    #   in-kernel f32 temporaries (upcast xf + normalized y): ~2 * H * 4
    bytes_per_row = 4 * hidden * in_itemsize + 8 * hidden
    max_rows_by_vmem = max(8, vmem_budget_bytes // max(bytes_per_row, 1))
    tile = min(int(max_rows_by_vmem), max(rows, 8))
    if rows >= 16:
        # Guarantee >= 2 grid steps: keeps the pipeline double-buffered and gives
        # the 2-TensorCore split on v7x something to shard.
        tile = min(tile, max(8, (((rows + 1) // 2) // 8) * 8))
    tile = max(8, (tile // 8) * 8)  # sublane multiple
    return int(tile)


def fast_layer_norm(x, weight, bias, *, tile_rows=None):
    """x: [..., H]; weight, bias: [H]. Returns same shape/dtype as x."""
    orig_shape = x.shape
    H = orig_shape[-1]
    rows = 1
    for d in orig_shape[:-1]:
        rows *= d
    x2 = x.reshape(rows, H)

    vmem_budget, vmem_limit = _vmem_plan()
    if tile_rows is None:
        tile_rows = _pick_tile_rows(rows, H, jnp.dtype(x.dtype).itemsize, vmem_budget)

    # Pre-cast params to f32 once in the wrapper: the (1, H) blocks stay VMEM-resident
    # across the grid, so no per-step astype/broadcast inside the kernel.
    w2 = weight.astype(jnp.float32).reshape(1, H)
    b2 = bias.astype(jnp.float32).reshape(1, H)

    # No jnp.pad: the last partial row block is masked by Pallas (op is strictly
    # per-row, so out-of-range rows cannot contaminate valid output).
    grid = (pl.cdiv(rows, tile_rows),)

    out2 = pl.pallas_call(
        _layernorm_kernel,
        out_shape=jax.ShapeDtypeStruct((rows, H), x.dtype),
        grid_spec=pltpu.PrefetchScalarGridSpec(
            num_scalar_prefetch=0,
            grid=grid,
            in_specs=[
                pl.BlockSpec((tile_rows, H), lambda i: (i, 0)),
                pl.BlockSpec((1, H), lambda i: (0, 0)),
                pl.BlockSpec((1, H), lambda i: (0, 0)),
            ],
            out_specs=pl.BlockSpec((tile_rows, H), lambda i: (i, 0)),
        ),
        compiler_params=pltpu.CompilerParams(
            dimension_semantics=("parallel",),
            vmem_limit_bytes=vmem_limit,
        ),
    )(x2, w2, b2)

    return out2.reshape(orig_shape)


def reference_layer_norm(x, weight, bias):
    x32 = x.astype(jnp.float32)
    u = jnp.mean(x32, axis=-1, keepdims=True)
    s = jnp.mean((x32 - u) ** 2, axis=-1, keepdims=True)
    y = (x32 - u) / jnp.sqrt(s + VARIANCE_EPSILON)
    return (weight.astype(jnp.float32) * y + bias.astype(jnp.float32)).astype(x.dtype)


if __name__ == "__main__":
    key = jax.random.PRNGKey(0)
    kx, kw, kb, kx2, kw2, kb2 = jax.random.split(key, 6)

    # --- Test 1: small f32 demo (H=32 -> full-dim block, masked-store path). ---
    batch, seq, hidden = 2, 8, 32
    x = jax.random.normal(kx, (batch, seq, hidden), dtype=jnp.float32)
    weight = jnp.ones((hidden,), dtype=jnp.float32) + 0.01 * jax.random.normal(kw, (hidden,))
    bias = jnp.zeros((hidden,), dtype=jnp.float32) + 0.01 * jax.random.normal(kb, (hidden,))

    out = jax.block_until_ready(fast_layer_norm(x, weight, bias))
    ref = reference_layer_norm(x, weight, bias)
    assert out.shape == x.shape and out.dtype == x.dtype
    assert jnp.allclose(out, ref, atol=1e-5, rtol=1e-5), "f32 mismatch vs reference"

    # --- Test 2: bf16 input, lane-dense H=128, rows=21 (partial last tile). ---
    b2_, s2_, h2_ = 3, 7, 128
    xb = jax.random.normal(kx2, (b2_, s2_, h2_), dtype=jnp.float32).astype(jnp.bfloat16)
    w_b = jnp.ones((h2_,), dtype=jnp.float32) + 0.05 * jax.random.normal(kw2, (h2_,))
    b_b = 0.05 * jax.random.normal(kb2, (h2_,))

    out_b = jax.block_until_ready(fast_layer_norm(xb, w_b, b_b))
    ref_b = reference_layer_norm(xb, w_b, b_b)
    assert out_b.shape == xb.shape and out_b.dtype == xb.dtype
    assert jnp.allclose(
        out_b.astype(jnp.float32), ref_b.astype(jnp.float32), atol=2e-2, rtol=2e-2
    ), "bf16 mismatch vs reference"

    print("KERNEL_OK")
</pallas_src>

<mosaic_0001>
module attributes {stable_mosaic.version = 11 : i64} {
  func.func @_layernorm_kernel(%arg0: i32, %arg1: memref<8x32xf32, #tpu.memory_space<vmem>>, %arg2: memref<1x32xf32, #tpu.memory_space<vmem>>, %arg3: memref<1x32xf32, #tpu.memory_space<vmem>>, %arg4: memref<8x32xf32, #tpu.memory_space<vmem>>) attributes {dimension_semantics = [#tpu.dimension_semantics<parallel>], iteration_bounds = array<i64: 2>, scalar_prefetch = 0 : i64, scratch_operands = 0 : i64, tpu.core_type = #tpu.core_type<tc>, window_params = [{transform_indices = @transform_0, window_bounds = array<i64: 8, 32>}, {pipeline_mode = #tpu.pipeline_mode<synchronous>, transform_indices = @transform_1, window_bounds = array<i64: 1, 32>}, {pipeline_mode = #tpu.pipeline_mode<synchronous>, transform_indices = @transform_2, window_bounds = array<i64: 1, 32>}, {transform_indices = @transform_3, window_bounds = array<i64: 8, 32>}]} {
    %c0 = arith.constant 0 : index
    %c0_0 = arith.constant 0 : index
    %0 = vector.load %arg1[%c0, %c0_0] : memref<8x32xf32, #tpu.memory_space<vmem>>, vector<8x32xf32>
    %cst = arith.constant dense<0.000000e+00> : vector<8xf32>
    %1 = vector.multi_reduction <add>, %0, %cst [1] : vector<8x32xf32> to vector<8xf32>
    %2 = vector.shape_cast %1 : vector<8xf32> to vector<8x1xf32>
    %cst_1 = arith.constant 3.200000e+01 : f32
    %3 = vector.broadcast %cst_1 : f32 to vector<8x1xf32>
    %4 = arith.divf %2, %3 : vector<8x1xf32>
    %5 = arith.mulf %0, %0 : vector<8x32xf32>
    %cst_2 = arith.constant dense<0.000000e+00> : vector<8xf32>
    %6 = vector.multi_reduction <add>, %5, %cst_2 [1] : vector<8x32xf32> to vector<8xf32>
    %7 = vector.shape_cast %6 : vector<8xf32> to vector<8x1xf32>
    %cst_3 = arith.constant 3.200000e+01 : f32
    %8 = vector.broadcast %cst_3 : f32 to vector<8x1xf32>
    %9 = arith.divf %7, %8 : vector<8x1xf32>
    %10 = arith.mulf %4, %4 : vector<8x1xf32>
    %11 = arith.subf %9, %10 : vector<8x1xf32>
    %cst_4 = arith.constant 0.000000e+00 : f32
    %12 = vector.broadcast %cst_4 : f32 to vector<8x1xf32>
    %13 = arith.maximumf %11, %12 : vector<8x1xf32>
    %cst_5 = arith.constant 9.99999996E-13 : f32
    %14 = vector.broadcast %cst_5 : f32 to vector<8x1xf32>
    %15 = arith.addf %13, %14 : vector<8x1xf32>
    %16 = math.rsqrt %15 : vector<8x1xf32>
    %17 = vector.broadcast %4 : vector<8x1xf32> to vector<8x32xf32>
    %18 = arith.subf %0, %17 : vector<8x32xf32>
    %19 = vector.broadcast %16 : vector<8x1xf32> to vector<8x32xf32>
    %20 = arith.mulf %18, %19 : vector<8x32xf32>
    %c0_6 = arith.constant 0 : index
    %c0_7 = arith.constant 0 : index
    %21 = vector.load %arg2[%c0_6, %c0_7] : memref<1x32xf32, #tpu.memory_space<vmem>>, vector<1x32xf32>
    %22 = vector.broadcast %21 : vector<1x32xf32> to vector<8x32xf32>
    %23 = arith.mulf %22, %20 : vector<8x32xf32>
    %c0_8 = arith.constant 0 : index
    %c0_9 = arith.constant 0 : index
    %24 = vector.load %arg3[%c0_8, %c0_9] : memref<1x32xf32, #tpu.memory_space<vmem>>, vector<1x32xf32>
    %25 = vector.broadcast %24 : vector<1x32xf32> to vector<8x32xf32>
    %26 = arith.addf %23, %25 : vector<8x32xf32>
    %c0_10 = arith.constant 0 : index
    %c0_11 = arith.constant 0 : index
    %27 = vector.load %arg4[%c0_10, %c0_11] : memref<8x32xf32, #tpu.memory_space<vmem>>, vector<8x32xf32>
    tpu.vector_store %arg4[%c0_10, %c0_11], %26 {strides = array<i32>} : memref<8x32xf32, #tpu.memory_space<vmem>>, vector<8x32xf32>,
    return
  }
  func.func @transform_0(%arg0: i32) -> (i32, i32) {
    %c0_i32 = arith.constant 0 : i32
    %c0_i32_0 = arith.constant 0 : i32
    return %arg0, %c0_i32 : i32, i32
  }
  func.func @transform_1(%arg0: i32) -> (i32, i32) {
    %c0_i32 = arith.constant 0 : i32
    %c0_i32_0 = arith.constant 0 : i32
    %c0_i32_1 = arith.constant 0 : i32
    return %c0_i32, %c0_i32_0 : i32, i32
  }
  func.func @transform_2(%arg0: i32) -> (i32, i32) {
    %c0_i32 = arith.constant 0 : i32
    %c0_i32_0 = arith.constant 0 : i32
    %c0_i32_1 = arith.constant 0 : i32
    return %c0_i32, %c0_i32_0 : i32, i32
  }
  func.func @transform_3(%arg0: i32) -> (i32, i32) {
    %c0_i32 = arith.constant 0 : i32
    %c0_i32_0 = arith.constant 0 : i32
    return %arg0, %c0_i32 : i32, i32
  }
}

</mosaic_0001>

<bundles_post_ra>
// kernel: tpu_custom_call.1
= control target key start
LH: loop header
LB: loop body
LE: loop exit
PB: predicated region body
PF: predicated region fallthrough
CT: control target
= control target key end

     0   :  { %8 = vsyncpa [#allocation3], 0  ;;  %s724_s0 = inlined_call_operand.hbm [shape: f32[16,32], index: 0, kind: input, shape index: {}]   ;;  %s725_s1 = inlined_call_operand.hbm [shape: f32[1,32], index: 1, kind: input, shape index: {}]   ;;  %s726_s2 = inlined_call_operand.vmem [shape: f32[1,32], index: 2, kind: input, shape index: {}]   ;;  %s727_s3 = inlined_call_operand.hbm [shape: f32[16,32], index: 3, kind: output, shape index: {}]  }
   0x1   :  { %10 = vsyncpa [#allocation3 + $0x1], 0 }
   0x2   :  { %11 = vsyncpa [#allocation6], 0 }
   0x3   :  { %12 = vsyncpa [#allocation4], 0 }
   0x4   :  { %14 = vsyncpa [#allocation4 + $0x1], 0  ;;  %s576_s12 = smov 0   ;;  %s578_s13 = smov 0  }
   0x5   :  { %s580_s14 = smov 0   ;;  %s582_s15 = smov 0  }
   0x6 LB: > { %s597_s16 = sadd.s32 4294967295, %s552_s15   ;;  %s344_s17 = sadd.s32 4294967294, %s552_s15   ;;  %s552_s15 = sphi %s582_s15, %s737_s15   ;;  %s548_s14 = sphi %s580_s14, %s736_s14   ;;  %s544_s13 = sphi %s578_s13, %s735_s13   ;;  %s540_s12 = sphi %s576_s12, %s734_s12  }
   0x7   : > { %p40_p0 = scmp.ne.s32.totalorder %s544_s13, %s540_s12  ;;  %p41_p1 = scmp.eq.s32.totalorder %s597_s16, 0 }
   0x8   : > { %p106_p2 = scmp.eq.s32.totalorder %s597_s16, 1  ;;  %p112_p3 = scmp.eq.s32.totalorder %s344_s17, 1 }
   0x9   : > { %p606_p4 = por %p41_p1, %p40_p0  ;;  %p345_p5 = scmp.ge.s32.totalorder %s552_s15, 1 }
   0xa   : > { %p611_p6 = por %p112_p3, %p40_p0  ;;  %p119_p7 = scmp.lt.s32.totalorder %s552_s15, 3 }
   0xb   : > { %s131_s22 = sshll.u32 %s725_s1, 4  ;;  %s554_s24 = smov [#allocation5]   ;;  %s132_s22 = int_to_ptr.hbm [resolvable:$true] %s131_s22 }
   0xc   : > { %p619_p8 = pnand %p345_p5, %p119_p7  ;;  %s133_s25 = sshll.u32 %s554_s24, 4  ;;  %s134_s25 = int_to_ptr.vmem [resolvable:$true] %s133_s25 }
   0xd   : > { %s629_s26 = sadd.s32 1, %s552_s15   ;;  %s27_s27 = sadd.s32 1, %s548_s14 }
   0xe   : > { %p366_p10 = pneg %p619_p8  ;;  %s24_s28 = ssub.s32 %s552_s15, %s629_s26 }
   0xf   : > { %p25_p12 = scmp.eq.s32.totalorder %s24_s28, 0  ;;  %p34_p13 = scmp.ne.s32.totalorder %s548_s14, %s544_s13 }
  0x10   : > { %p367_p11 = pnand %p366_p10, %p41_p1  ;;  %p35_p0 = scmp.eq.s32.totalorder %s552_s15, 0 }
  0x11   : > { %s638_s29 = scalar_select %p25_p12, %s548_s14, %s27_s27  }
  0x12   : > { %369 = dma.hbm_to_vmem [thread:$0]  (!%p367_p11), %s132_s22, 16, %s134_s25, [#allocation6]  }
  0x13   : > { %p642_p3 = por %p106_p2, %p34_p13  ;;  %p379_p5 = scmp.lt.s32.totalorder %s552_s15, 2 }
  0x14   : > { %s147_s4 = sand.u32 1, %s548_s14   ;;  %s349_s5 = sshll.u32 %s552_s15, 3 }
  0x15   : > { %p36_p7 = por %p35_p0, %p34_p13  ;;  %s348_s6 = sshll.u32 %s147_s4, 3 }
  0x16   : > { %s155_s9 = scalar_lea.hbm %s724_s0, %s349_s5  ;;  %s151_s11 = scalar_lea.vmem [#allocation2], %s348_s6 }
  0x17   : > { %s157_s10 = sshll.u32 %s155_s9, 4  ;;  %s159_s17 = sshll.u32 %s151_s11, 4  ;;  %s158_s10 = int_to_ptr.hbm [resolvable:$true] %s157_s10  ;;  %s160_s17 = int_to_ptr.vmem [resolvable:$true] %s159_s17 }
  0x18   : > { %p652_p10 = pnand %p379_p5, %p36_p7  ;;  %s148_s21 = scalar_lea.sflag [#allocation3], %s147_s4 }
  0x19   : > { %s452_s22 = sshra.s32 %s158_s10, 4  ;;  %s459_s28 = scalar_lea.hbm %s724_s0, 16  ;;  %s453_s22 = int_to_ptr.hbm [resolvable:$true] %s452_s22 }
  0x1a   : > { %s454_s24 = scalar_lea.hbm %s453_s22, 8  ;;  %p456_p11 = pneg %p652_p10 }
  0x1b   : > { %p455_p2 = scmp.ne.s32.totalorder %s453_s22, %s454_s24  ;;  %p460_p0 = scmp.lt.s32.totalorder %s453_s22, %s724_s0 }
  0x1c   : > { %p461_p5 = scmp.lt.s32.totalorder %s459_s28, %s454_s24 }
  0x1d   : > { %p457_p12 = pnand %p456_p11, %p455_p2 }
  0x1e   : > { %p462_p7 = por %p461_p5, %p460_p0 }
  0x1f   : > { %p458_p13 = pneg %p457_p12 }
  0x21   : > { %p463_p9 = pnand %p462_p7, %p458_p13 }
  0x23   : > { %466 = shalt.err (!%p463_p9)
}
  0x24   : > { %373 = dma.hbm_to_vmem [thread:$0]  (!%p652_p10), %s158_s10, 128, %s160_s17, %s148_s21  }
  0x25   : > { %168 = sbr.rel (%p619_p8) target bundleno = 206 (0xce), region = 32  ;;  %s669_s4 = sand.u32 (!%p619_p8), 1, %s544_s13  }
  0x26   : > { %s351_s7 = sshll.u32 (!%p619_p8), %s669_s4, 3  ;;  %s171_s8 = scalar_lea.sflag (!%p619_p8), [#allocation3], %s669_s4 }
  0x27   : > { %s174_s9 = scalar_lea.vmem (!%p619_p8), [#allocation2], %s351_s7 }
  0x2a   : > { %527 = dma.done.wait (%p606_p4), %s171_s8, 128  }
  0x2b   : > { %529 = vsyncadd (%p606_p4), %s171_s8, 4294967168 }
  0x2c   : > { %531 = dma.done.wait (%p41_p1), [#allocation6], 16  }
  0x2d   : > { %533 = vsyncadd (%p41_p1), [#allocation6], 4294967280  ;;  %vm204_vm0 = vcmask 261120   ;;  %v203_v0 = vld [vmem:[%s174_s9] sm:$0xff]  ;;  %v555_v4 = vmov 32.0   ;;  %s355_s18 = sshll.u32 %s597_s16, 3 }
  0x2e   : > { %v205_v1 = vsel %vm204_vm0, %v203_v0, 0.0  ;;  %v216_v2 = vmul.f32 %v203_v0, %v203_v0  ;;  %418 = vrcp.f32 %v555_v4  ;;  %v416_v26 = vld [vmem:[#allocation5] ss:$0 sm:$0xff]  ;;  %s259_s11 = scalar_lea.hbm %s727_s3, %s355_s18  ;;  %v417_v29 = vld [vmem:[%s726_s2] ss:$0 sm:$0xff]  ;;  %s202_s21 = scalar_lea.vmem [#allocation7], %s351_s7 }
  0x2f   : > { %206 = vadd.xlane.f32.xlu0 %v205_v1  ;;  %s261_s16 = sshll.u32 %s202_s21, 4  ;;  %s263_s22 = sshll.u32 %s259_s11, 4  ;;  %s262_s16 = int_to_ptr.vmem [resolvable:$true] %s261_s16  ;;  %s264_s22 = int_to_ptr.hbm [resolvable:$true] %s263_s22 }
  0x30   : > { %v217_v3 = vsel %vm204_vm0, %v216_v2, 0.0  ;;  %s249_s24 = scalar_lea.sflag [#allocation4], %s669_s4  ;;  %s496_s25 = sshra.s32 %s264_s22, 4  ;;  %s497_s25 = int_to_ptr.hbm [resolvable:$true] %s496_s25 }
  0x31   : > { %s498_s27 = scalar_lea.hbm %s497_s25, 8  ;;  %s502_s6 = scalar_lea.hbm %s727_s3, 16 }
  0x32   : > { %p499_p1 = scmp.ne.s32.totalorder %s497_s25, %s498_s27  ;;  %p503_p9 = scmp.lt.s32.totalorder %s497_s25, %s727_s3 }
  0x33   : > { %p504_p10 = scmp.lt.s32.totalorder %s502_s6, %s498_s27 }
  0x34   : > { %v419_v5 = vpop.eup %418  ;;  %p500_p4 = pnand %p499_p1, %p642_p3 }
  0x35   : > { %v209_v6 = vmul.f32 32.0, %v419_v5  ;;  %vm213_vm1 = vweird.f32 %v419_v5  ;;  %p505_p2 = por %p504_p10, %p503_p9 }
  0x36   : > { %p501_p8 = pneg %p500_p4 }
  0x37   : > { %218 = vadd.xlane.f32.xlu0 %v217_v3  ;;  %v210_v7 = vsub.f32 1.0, %v209_v6 }
  0x38   : > { %p506_p11 = pnand %p505_p2, %p501_p8 }
  0x39   : > { %v211_v8 = vmul.f32 %v419_v5, %v210_v7 }
  0x3b   : > { %v212_v9 = vadd.f32 %v419_v5, %v211_v8 }
  0x3d   : > { %v214_v11 = vsel %vm213_vm1, %v419_v5, %v212_v9 }
  0xa2   : > { %v207_v10 = vpop.xlane.xlu0 %206 }
  0xa3   : > { %v215_v12 = vmul.f32 %v214_v11, %v207_v10 }
  0xa5   : > { %v221_v14 = vmul.f32 %v215_v12, %v215_v12  ;;  %v235_v25 = vsub.f32 %v203_v0, %v215_v12 }
  0xaa   : > { %v219_v13 = vpop.xlane.xlu0 %218 }
  0xab   : > { %v220_v15 = vmul.f32 %v219_v13, %v214_v11 }
  0xad   : > { %v222_v16 = vsub.f32 %v220_v15, %v221_v14 }
  0xaf   : > { %v223_v17 = vmax.f32 %v222_v16, 0.0 }
  0xb1   : > { %v224_v18 = vadd.f32 1e-12, %v223_v17 }
  0xb3   : > { %420 = vrsqrt.f32 %v224_v18  ;;  %vm231_vm3 = vweird.f32 %v224_v18 }
  0xb9   : > { %v421_v19 = vpop.eup %420 }
  0xba   : > { %v226_v20 = vmul.f32 %v421_v19, %v224_v18  ;;  %vm232_vm2 = vweird.f32 %v421_v19 }
  0xbb   : > { %vm233_vm4 = vmor %vm231_vm3, %vm232_vm2 }
  0xbc   : > { %v227_v21 = vmul.f32 %v421_v19, %v226_v20 }
  0xbe   : > { %v228_v22 = vmul.f32 0.5, %v227_v21 }
  0xc0   : > { %v229_v23 = vsub.f32 1.5, %v228_v22 }
  0xc2   : > { %v230_v24 = vmul.f32 %v421_v19, %v229_v23 }
  0xc4   : > { %v234_v27 = vsel %vm233_vm4, %v421_v19, %v230_v24 }
  0xc5   : > { %v236_v28 = vmul.f32 %v235_v25, %v234_v27 }
  0xc7   : > { %v241_v30 = vmul.f32 %v416_v26, %v236_v28 }
  0xc9   : > { %v246_v31 = vadd.f32 %v417_v29, %v241_v30 }
  0xcb   : > { %247 = vst.msk [vmem:[%s202_s21] sm:$0xff] %vm204_vm0, %v246_v31 }
  0xcc   : > { %509 = shalt.err (!%p506_p11)
}
  0xcd   : > { %364 = dma.vmem_to_hbm [thread:$0]  (%p642_p3), %s262_s16, 128, %s264_s22, %s249_s24  }
  0xce PF: > { %s275_s4 = sand.u32 1, %s540_s12   ;;  %p733_p12 = scmp.ge.s32.totalorder %s552_s15, 2 }
  0xcf   : > { %s276_s9 = scalar_lea.sflag [#allocation4], %s275_s4 }
  0xd0   : > { %p375_p13 = pnand %p733_p12, %p611_p6 }
  0xd2   : > { %p376_p0 = pneg %p375_p13 }
  0xd4   : > { %535 = dma.done.wait (%p376_p0), %s276_s9, 128  }
  0xd5   : > { %537 = vsyncadd (%p376_p0), %s276_s9, 4294967168  ;;  %p17_p5 = scmp.ge.s32.totalorder %s629_s26, 4   ;;  %s734_s12 = smov %s544_s13 }
  0xd6   : > { %s735_s13 = smov %s548_s14  ;;  %s736_s14 = smov %s638_s29 }
  0xd7   : > { %s737_s15 = smov %s629_s26  ;;  %19 = sbr.rel (!%p17_p5) target bundleno = 6 (0x6), region = 81 }
  0xdc   :  { %282 = vsyncpa [#allocation3], 1 }
  0xdd   :  { %284 = vsyncpa [#allocation3 + $0x1], 1 }
  0xde   :  { %285 = vsyncpa [#allocation6], 1 }
  0xdf   :  { %286 = vsyncpa [#allocation4], 1 }
  0xe0   :  { %288 = vsyncpa [#allocation4 + $0x1], 1 }

</bundles_post_ra>
